<compile_context>
chip_gen: v5e
topology: v5e:2x2
jax: 0.10.0
libtpu: 0.0.40
codegen_flags: <defaults>
</compile_context>

<pallas_src>
import math

import jax
import jax.numpy as jnp
from jax.experimental import pallas as pl
from jax.experimental.pallas import tpu as pltpu

_NUM_CORES = 2                    # v7x megacore split; harmless on v5e/v6e
_LANES = 128
_TARGET_BLOCK_BYTES = 2 * 1024 * 1024   # padded bytes per pipelined input buffer
_ROW_BYTES_CAP = 256 * 1024             # padded bytes of one fused row


def _round_up(v, m):
    return (v + m - 1) // m * m


def _divisors(n):
    out = set()
    d = 1
    while d * d <= n:
        if n % d == 0:
            out.add(d)
            out.add(n // d)
        d += 1
    return sorted(out)


def _choose_layout(bsz, cols, itemsize, target_block_bytes, row_bytes_cap):
    """Pick a free row-major regrouping (bsz, cols) -> (rows, C=g*cols) that is
    as lane-dense as possible, and a block row count tb sized by padded VMEM
    bytes."""
    sub_mult = {1: 32, 2: 16}.get(itemsize, 8)
    best = None
    for g in _divisors(bsz):
        C = g * cols
        padded_c = _round_up(C, _LANES)
        row_bytes = padded_c * itemsize
        if row_bytes > row_bytes_cap and g != 1:
            continue
        # primary: lane utilisation; secondary: smaller fused rows (finer grid)
        key = (C / padded_c, -C)
        if best is None or key > best[0]:
            best = (key, g, row_bytes)
    _, g, row_bytes = best
    rows = bsz // g
    C = g * cols
    if rows == 1:
        tb = 1
    else:
        tb = (target_block_bytes // row_bytes) // sub_mult * sub_mult
        tb = max(tb, sub_mult)
        if tb >= rows:
            tb = rows                       # full-dim block is always legal
    return rows, C, tb


def _make_nce_kernel(tb, C, rows, bpc, total_blocks, cadd,
                     needs_row_mask, needs_block_guard):
    """Streaming sum of log(x + c) over lane-dense (tb, C) blocks."""

    def _accumulate(x_ref, acc_ref, blk):
        xf = x_ref[...].astype(jnp.float32)           # native dtype in, f32 math
        if needs_row_mask:
            r = jax.lax.broadcasted_iota(jnp.int32, (tb, C), 0)
            valid = (blk * tb + r) < rows
            xf = jnp.where(valid, xf, 1.0 - cadd)     # log(x + c) == 0 when masked
        # Cheap sublane reduce into resident per-lane partials; the cross-lane
        # reduce is deferred to the last grid step.
        acc_ref[...] += jnp.sum(jnp.log(xf + cadd), axis=0, keepdims=True)

    def kernel(x_ref, out_ref, acc_ref):
        core = pl.program_id(0)
        i = pl.program_id(1)
        blk = core * bpc + i

        @pl.when(i == 0)
        def _init():
            acc_ref[...] = jnp.zeros_like(acc_ref)

        if needs_block_guard:
            # Over-coverage block (megacore rounding): skip all vector work.
            @pl.when(blk < total_blocks)
            def _compute():
                _accumulate(x_ref, acc_ref, blk)
        else:
            _accumulate(x_ref, acc_ref, blk)

        @pl.when(i == pl.num_programs(1) - 1)
        def _finish():
            out_ref[...] = jnp.broadcast_to(
                jnp.sum(acc_ref[...]), out_ref.shape).astype(jnp.float32)

    return kernel


def nce_loss(x, n_data, eps=1e-5,
             target_block_bytes=_TARGET_BLOCK_BYTES,
             row_bytes_cap=_ROW_BYTES_CAP):
    """Pallas-TPU equivalent of NCECriterion.forward(x)."""
    if x.ndim == 3 and x.shape[-1] == 1:     # common (bsz, m+1, 1) layout
        x = x[..., 0]
    assert x.ndim == 2, "x must be (bsz, m+1)"
    bsz, cols = x.shape
    m = cols - 1
    pn = 1.0 / float(n_data)
    m_pn = m * pn
    cadd = m_pn + eps

    # Keep native dtype (no host-side f32 copy); only normalize exotic dtypes.
    if x.dtype.itemsize > 4 or not jnp.issubdtype(x.dtype, jnp.floating):
        x = x.astype(jnp.float32)
    itemsize = x.dtype.itemsize

    rows, C, tb = _choose_layout(bsz, cols, itemsize,
                                 target_block_bytes, row_bytes_cap)
    x2 = x.reshape(rows, C)                  # free row-major metadata reshape

    total_blocks = pl.cdiv(rows, tb)
    bpc = pl.cdiv(total_blocks, _NUM_CORES)  # blocks per core
    needs_row_mask = (rows % tb) != 0
    needs_block_guard = (bpc * _NUM_CORES) != total_blocks

    if needs_block_guard:
        def x_map(core, i):
            # Clamp so the DMA never starts out of bounds; the kernel's block
            # guard discards the (re-read) data of fully-OOB blocks.
            return (jnp.minimum(core * bpc + i, total_blocks - 1), 0)
    else:
        def x_map(core, i):
            return (core * bpc + i, 0)

    kernel = _make_nce_kernel(tb, C, rows, bpc, total_blocks, cadd,
                              needs_row_mask, needs_block_guard)
    n_elem = bsz * cols

    partials = pl.pallas_call(
        kernel,
        out_shape=jax.ShapeDtypeStruct((_NUM_CORES, 8, 128), jnp.float32),
        grid_spec=pltpu.PrefetchScalarGridSpec(
            num_scalar_prefetch=0,
            grid=(_NUM_CORES, bpc),
            in_specs=[pl.BlockSpec((tb, C), x_map)],
            out_specs=pl.BlockSpec((1, 8, 128), lambda core, i: (core, 0, 0)),
            scratch_shapes=[pltpu.VMEM((1, C), jnp.float32)],  # lane partials
        ),
        compiler_params=pltpu.CompilerParams(
            dimension_semantics=("parallel", "arbitrary"),
        ),
        cost_estimate=pl.CostEstimate(
            flops=4 * n_elem,
            transcendentals=n_elem,
            bytes_accessed=itemsize * n_elem,
        ),
    )(x2)

    den_sum = jnp.sum(partials[:, 0, 0])                  # per-core partials
    # Positive-score term: bsz elements, negligible HBM — kept out of the
    # streaming kernel so the kernel does exactly one log per element.
    pos_sum = jnp.sum(jnp.log(x[:, 0].astype(jnp.float32)))
    neg_const = (bsz * m) * math.log(m_pn) if m > 0 else 0.0
    loss_sum = pos_sum + neg_const - den_sum
    return -loss_sum / bsz


class NCECriterion:
    """Thin JAX wrapper mirroring the PyTorch module."""

    def __init__(self, n_data):
        self.n_data = n_data

    def __call__(self, x):
        return nce_loss(x, self.n_data)


def _reference(x, n_data, eps=1e-5):
    """Pure-JAX transcription of the PyTorch forward, for verification."""
    x = x.astype(jnp.float32)
    bsz = x.shape[0]
    m = x.shape[1] - 1
    pn = 1.0 / float(n_data)
    p_pos = x[:, 0]
    log_d1 = jnp.log(p_pos / (p_pos + m * pn + eps))
    p_neg = x[:, 1:]
    log_d0 = jnp.log((m * pn) / (p_neg + m * pn + eps))
    return -(jnp.sum(log_d1) + jnp.sum(log_d0)) / bsz


if __name__ == "__main__":
    key = jax.random.PRNGKey(0)
    n_data = 1000

    # 1) Canonical small case: (bsz=64, m+1=33), f32.
    x1 = jax.random.uniform(key, (64, 33), minval=0.05, maxval=1.0,
                            dtype=jnp.float32)
    crit = NCECriterion(n_data)
    loss1 = jax.block_until_ready(crit(x1))
    ref1 = _reference(x1, n_data)
    assert jnp.allclose(loss1, ref1, rtol=1e-4, atol=5e-3), (loss1, ref1)

    # 2) Native-dtype path: bf16 input streamed without a host-side f32 copy.
    x2 = x1.astype(jnp.bfloat16)
    loss2 = jax.block_until_ready(nce_loss(x2, n_data))
    ref2 = _reference(x2, n_data)
    assert jnp.allclose(loss2, ref2, rtol=1e-4, atol=5e-3), (loss2, ref2)

    # 3) Multi-block path (small block override): exercises the megacore block
    #    guard and the ragged-row mask.
    k3 = jax.random.PRNGKey(1)
    x3 = jax.random.uniform(k3, (875, 33), minval=0.05, maxval=1.0,
                            dtype=jnp.float32)
    loss3 = jax.block_until_ready(
        nce_loss(x3, n_data, target_block_bytes=4096, row_bytes_cap=4096))
    ref3 = _reference(x3, n_data)
    assert jnp.allclose(loss3, ref3, rtol=1e-4, atol=5e-3), (loss3, ref3)

    print("KERNEL_OK")
</pallas_src>

<mosaic_0001>
module attributes {stable_mosaic.version = 11 : i64} {
  func.func @kernel(%arg0: i32, %arg1: i32, %arg2: memref<1x2112xf32, #tpu.memory_space<vmem>>, %arg3: memref<1x8x128xf32, #tpu.memory_space<vmem>>, %arg4: memref<1x2112xf32, #tpu.memory_space<vmem>>) attributes {dimension_semantics = [#tpu.dimension_semantics<parallel>, #tpu.dimension_semantics<arbitrary>], iteration_bounds = array<i64: 2, 1>, scalar_prefetch = 0 : i64, scratch_operands = 1 : i64, tpu.core_type = #tpu.core_type<tc>, window_params = [{transform_indices = @transform_0, window_bounds = array<i64: 1, 2112>}, {transform_indices = @transform_1, window_bounds = array<i64: 1, 8, 128>}]} {
    %c1_i32 = arith.constant 1 : i32
    %0 = arith.muli %arg0, %c1_i32 : i32
    %1 = arith.addi %0, %arg1 : i32
    %c0_i32 = arith.constant 0 : i32
    %2 = arith.cmpi eq, %arg1, %c0_i32 : i32
    %3 = arith.extui %2 : i1 to i32
    %c0_i32_0 = arith.constant 0 : i32
    %4 = arith.cmpi ne, %3, %c0_i32_0 : i32
    scf.if %4 {
      %cst = arith.constant 0.000000e+00 : f32
      %11 = vector.broadcast %cst : f32 to vector<1x2112xf32>
      %c0 = arith.constant 0 : index
      %c0_5 = arith.constant 0 : index
      %12 = vector.load %arg4[%c0, %c0_5] : memref<1x2112xf32, #tpu.memory_space<vmem>>, vector<1x2112xf32>
      tpu.vector_store %arg4[%c0, %c0_5], %11 {strides = array<i32>} : memref<1x2112xf32, #tpu.memory_space<vmem>>, vector<1x2112xf32>,
    } else {
    }
    %c1_i32_1 = arith.constant 1 : i32
    %5 = arith.cmpi slt, %1, %c1_i32_1 : i32
    %6 = arith.extui %5 : i1 to i32
    %c0_i32_2 = arith.constant 0 : i32
    %7 = arith.cmpi ne, %6, %c0_i32_2 : i32
    scf.if %7 {
      %c0 = arith.constant 0 : index
      %c0_5 = arith.constant 0 : index
      %11 = vector.load %arg2[%c0, %c0_5] : memref<1x2112xf32, #tpu.memory_space<vmem>>, vector<1x2112xf32>
      %c0_6 = arith.constant 0 : index
      %c0_7 = arith.constant 0 : index
      %12 = vector.load %arg4[%c0_6, %c0_7] : memref<1x2112xf32, #tpu.memory_space<vmem>>, vector<1x2112xf32>
      %cst = arith.constant 3.201000e-02 : f32
      %13 = vector.broadcast %cst : f32 to vector<1x2112xf32>
      %14 = arith.addf %11, %13 : vector<1x2112xf32>
      %15 = math.log %14 : vector<1x2112xf32>
      %cst_8 = arith.constant dense<0.000000e+00> : vector<2112xf32>
      %16 = vector.multi_reduction <add>, %15, %cst_8 [0] : vector<1x2112xf32> to vector<2112xf32>
      %17 = vector.shape_cast %16 : vector<2112xf32> to vector<1x2112xf32>
      %18 = arith.addf %12, %17 : vector<1x2112xf32>
      %c0_9 = arith.constant 0 : index
      %c0_10 = arith.constant 0 : index
      %19 = vector.load %arg4[%c0_9, %c0_10] : memref<1x2112xf32, #tpu.memory_space<vmem>>, vector<1x2112xf32>
      tpu.vector_store %arg4[%c0_9, %c0_10], %18 {strides = array<i32>} : memref<1x2112xf32, #tpu.memory_space<vmem>>, vector<1x2112xf32>,
    } else {
    }
    %c0_i32_3 = arith.constant 0 : i32
    %8 = arith.cmpi eq, %arg1, %c0_i32_3 : i32
    %9 = arith.extui %8 : i1 to i32
    %c0_i32_4 = arith.constant 0 : i32
    %10 = arith.cmpi ne, %9, %c0_i32_4 : i32
    scf.if %10 {
      %c0 = arith.constant 0 : index
      %c0_5 = arith.constant 0 : index
      %11 = vector.load %arg4[%c0, %c0_5] : memref<1x2112xf32, #tpu.memory_space<vmem>>, vector<1x2112xf32>
      %12 = vector.shape_cast %11 : vector<1x2112xf32> to vector<1x1x2112xf32>
      %cst = arith.constant dense<0.000000e+00> : vector<1xf32>
      %13 = vector.multi_reduction <add>, %12, %cst [1, 2] : vector<1x1x2112xf32> to vector<1xf32>
      %14 = vector.shape_cast %13 : vector<1xf32> to vector<1x1x1xf32>
      %15 = vector.extract %14[0, 0, 0] : f32 from vector<1x1x1xf32>
      %16 = vector.broadcast %15 : f32 to vector<1x8x128xf32>
      %c0_6 = arith.constant 0 : index
      %c0_7 = arith.constant 0 : index
      %c0_8 = arith.constant 0 : index
      %17 = vector.load %arg3[%c0_6, %c0_7, %c0_8] : memref<1x8x128xf32, #tpu.memory_space<vmem>>, vector<1x8x128xf32>
      tpu.vector_store %arg3[%c0_6, %c0_7, %c0_8], %16 {strides = array<i32>} : memref<1x8x128xf32, #tpu.memory_space<vmem>>, vector<1x8x128xf32>,
    } else {
    }
    return
  }
  func.func @transform_0(%arg0: i32, %arg1: i32) -> (i32, i32) {
    %c1_i32 = arith.constant 1 : i32
    %0 = arith.muli %arg0, %c1_i32 : i32
    %1 = arith.addi %0, %arg1 : i32
    %c0_i32 = arith.constant 0 : i32
    %2 = arith.minsi %1, %c0_i32 : i32
    %c0_i32_0 = arith.constant 0 : i32
    %c0_i32_1 = arith.constant 0 : i32
    return %2, %c0_i32_0 : i32, i32
  }
  func.func @transform_1(%arg0: i32, %arg1: i32) -> (i32, i32, i32) {
    %c0_i32 = arith.constant 0 : i32
    %c0_i32_0 = arith.constant 0 : i32
    %c0_i32_1 = arith.constant 0 : i32
    return %arg0, %c0_i32, %c0_i32_0 : i32, i32, i32
  }
}

</mosaic_0001>

<bundles_post_ra>
// kernel: tpu_custom_call.1
= control target key start
LH: loop header
LB: loop body
LE: loop exit
PB: predicated region body
PF: predicated region fallthrough
CT: control target
= control target key end

     0   :  { %6 = vsyncpa [#allocation4], 0  ;;  %s818_s0 = inlined_call_operand.hbm [shape: f32[1,2112], index: 0, kind: input, shape index: {}]   ;;  %s819_s1 = inlined_call_operand.hbm [shape: f32[2,8,128], index: 1, kind: output, shape index: {}]  }
   0x1   :  { %8 = vsyncpa [#allocation4 + $0x1], 0 }
   0x2   :  { %9 = vsyncpa [#allocation5], 0 }
   0x3   :  { %11 = vsyncpa [#allocation5 + $0x1], 0  ;;  %s642_s6 = smov 0   ;;  %s644_s7 = smov 0  }
   0x4   :  { %s646_s8 = smov 0   ;;  %s648_s9 = smov 0  }
   0x5   :  { %s650_s10 = smov 0   ;;  %s652_s11 = smov 0  }
   0x6   :  { %s654_s12 = smov 0   ;;  %s656_s13 = smov 0  }
   0x7 LB: > { %s385_s14 = sadd.s32 4294967295, %s628_s13   ;;  %s386_s15 = sadd.s32 4294967294, %s628_s13   ;;  %s628_s13 = sphi %s656_s13, %s17_s13   ;;  %s624_s12 = sphi %s654_s12, %s832_s12   ;;  %s620_s11 = sphi %s652_s11, %s831_s11   ;;  %s616_s10 = sphi %s650_s10, %s808_s10   ;;  %s612_s9 = sphi %s648_s9, %s830_s9   ;;  %s608_s8 = sphi %s646_s8, %s829_s8   ;;  %s604_s7 = sphi %s644_s7, %s828_s7   ;;  %s600_s6 = sphi %s642_s6, %s827_s6  }
   0x8   : > { %s29_s16 = sadd.s32 1, %s624_s12  ;;  %p597_p1 = scmp.ne.s32.totalorder %s616_s10, 0 }
   0x9   : > { %p31_p0 = scmp.ge.s32.totalorder %s29_s16, 2  ;;  %p50_p2 = scmp.eq.s32.totalorder %s628_s13, 0 }
   0xa   : > { %p55_p3 = scmp.ne.s32.totalorder %s616_s10, %s612_s9  ;;  %p56_p5 = scmp.eq.s32.totalorder %s385_s14, 0 }
   0xb   : > { %s834_s16 = smov (%p31_p0, %s29_s16), 0  ;;  %p688_p4 = por %p597_p1, %p50_p2 }
   0xc   : > { %p692_p6 = por %p56_p5, %p55_p3  ;;  %s65_s19 = ssub.s32 %s624_s12, %s834_s16 }
   0xd   : > { %p66_p7 = scmp.eq.s32.totalorder %s65_s19, 0  ;;  %s68_s20 = sadd.s32 1, %s608_s8 }
   0xe   : > { %p78_p8 = scmp.ne.s32.totalorder %s608_s8, %s604_s7  ;;  %p79_p9 = scmp.eq.s32.totalorder %s385_s14, 1 }
   0xf   : > { %s700_s21 = scalar_select %p66_p7, %s608_s8, %s68_s20  }
  0x10   : > { %p84_p10 = scmp.ne.s32.totalorder %s604_s7, %s600_s6  ;;  %p85_p11 = scmp.eq.s32.totalorder %s386_s15, 1 }
  0x11   : > { %p706_p12 = por %p79_p9, %p78_p8  ;;  %p388_p13 = scmp.ge.s32.totalorder %s628_s13, 2 }
  0x12   : > { %p711_p0 = por %p85_p11, %p84_p10  ;;  %p413_p1 = scmp.lt.s32.totalorder %s628_s13, 2 }
  0x13   : > { %s118_s27 = sshll.u32 %s818_s0, 4  ;;  %s630_s28 = smov [#allocation3]   ;;  %s119_s27 = int_to_ptr.hbm [resolvable:$true] %s118_s27 }
  0x14   : > { %p718_p2 = pnand %p413_p1, %p688_p4  ;;  %s120_s29 = sshll.u32 %s630_s28, 4  ;;  %s121_s29 = int_to_ptr.vmem [resolvable:$true] %s120_s29 }
  0x15   : > { %s495_s30 = sshra.s32 %s119_s27, 4  ;;  %s502_s5 = scalar_lea.hbm %s818_s0, 17  ;;  %s496_s30 = int_to_ptr.hbm [resolvable:$true] %s495_s30 }
  0x16   : > { %s497_s2 = scalar_lea.hbm %s496_s30, 17  ;;  %p499_p5 = pneg %p718_p2 }
  0x17   : > { %p498_p3 = scmp.ne.s32.totalorder %s496_s30, %s497_s2  ;;  %p504_p8 = scmp.lt.s32.totalorder %s502_s5, %s497_s2 }
  0x19   : > { %p500_p7 = pnand %p499_p5, %p498_p3 }
  0x1b   : > { %p501_p4 = pneg %p500_p7 }
  0x1d   : > { %p506_p9 = pnand %p504_p8, %p501_p4 }
  0x1f   : > { %509 = shalt.err (!%p506_p9)
}
  0x20   : > { %408 = dma.hbm_to_vmem [thread:$0]  (!%p718_p2), %s119_s27, 272, %s121_s29, [#allocation4]  }
  0x21   : > { %p389_p10 = scmp.ge.s32.totalorder %s628_s13, 1  ;;  %p125_p11 = scmp.lt.s32.totalorder %s628_s13, 3 }
  0x23   : > { %p126_p1 = pnand %p389_p10, %p125_p11 }
  0x24   : > { %s131_s9 = sand.u32 (!%p126_p1), 1, %s616_s10  }
  0x25   : > { %129 = sbr.rel (%p126_p1) target bundleno = 289 (0x121), region = 24  ;;  %s132_s15 = scalar_lea.sflag (!%p126_p1), [#allocation4], %s131_s9 }
  0x26   : > { %s398_s14 = smul.u32 (!%p126_p1), 17, %s131_s9 }
  0x28   : > { %s135_s17 = scalar_lea.vmem (!%p126_p1), [#allocation3], %s398_s14 }
  0x2a   : > { %590 = dma.done.wait (%p692_p6), %s132_s15, 272  }
  0x2b   : > { %592 = vsyncadd (%p692_p6), %s132_s15, 4294967024  ;;  %s152_s19 = sand.u32 1, %s604_s7   ;;  %v165_v0 = vlaneseq  ;;  %v631_v1 = vmov 0.0   ;;  %p391_p6 = scmp.ge.s32.totalorder %s620_s11, 1 }
  0x2c   : > { %s742_s20 = sshll.u32 %s152_s19, 3  ;;  %163 = vst [vmem:[#allocation2] sm:$0xff] %v631_v1 }
  0x2d   : > { %164 = vst [vmem:[#allocation2 + $0x8] sm:$0xff] %v631_v1  ;;  %vm744_vm0 = vcmp.lt.s32.totalorder %v165_v0, 64  ;;  %s154_s18 = scalar_lea.vmem [#allocation6], %s742_s20  ;;  %173 = sbr.rel (%p391_p6) target bundleno = 67 (0x43), region = 36 }
  0x2e   : > { %169 = vst.msk [vmem:[#allocation2 + $0x10] sm:$0x1] %vm744_vm0, %v631_v1 }
  0x32   : > { %v174_v3 = vld [vmem:[%s135_s17] sm:$0xff]  ;;  %v175_v4 = vld [vmem:[%s135_s17 + $0x8] sm:$0xff]  ;;  %v176_v7 = vld [vmem:[%s135_s17 + $0x10] sm:$0x1] }
  0x33   : > { %v180_v5 = vadd.f32 0.03201, %v174_v3  ;;  %v181_v6 = vadd.f32 0.03201, %v175_v4  ;;  %v182_v8 = vadd.f32 0.03201, %v176_v7 }
  0x34   : > { %v177_v10 = vld [vmem:[#allocation2] sm:$0xff]  ;;  %v178_v13 = vld [vmem:[#allocation2 + $0x8] sm:$0xff] }
  0x35   : > { %488 = vlog2.f32 %v180_v5  ;;  %v179_v16 = vld [vmem:[#allocation2 + $0x10] sm:$0x1] }
  0x36   : > { %490 = vlog2.f32 %v181_v6 }
  0x37   : > { %492 = vlog2.f32 %v182_v8 }
  0x3b   : > { %v489_v9 = vpop.eup %488 }
  0x3c   : > { %v491_v11 = vpop.eup %490  ;;  %v184_v12 = vmul.f32 0.6931472, %v489_v9 }
  0x3d   : > { %v493_v14 = vpop.eup %492  ;;  %v186_v15 = vmul.f32 0.6931472, %v491_v11 }
  0x3e   : > { %v192_v17 = vadd.f32 %v184_v12, %v177_v10  ;;  %v188_v18 = vmul.f32 0.6931472, %v493_v14 }
  0x3f   : > { %v193_v19 = vadd.f32 %v186_v15, %v178_v13 }
  0x40   : > { %195 = vst [vmem:[#allocation2] sm:$0xff] %v192_v17  ;;  %v194_v20 = vadd.f32 %v188_v18, %v179_v16 }
  0x41   : > { %196 = vst [vmem:[#allocation2 + $0x8] sm:$0xff] %v193_v19 }
  0x42   : > { %201 = vst.msk [vmem:[#allocation2 + $0x10] sm:$0x1] %vm744_vm0, %v194_v20 }
  0x43 PF: > { %vm245_vm1 = vcmask 1040384   ;;  %vm277_vm2 = vcmask 516096   ;;  %s393_s24 = sshll.u32 %s620_s11, 3  ;;  %s304_s28 = sshll.u32 %s154_s18, 4  ;;  %s305_s28 = int_to_ptr.vmem [resolvable:$true] %s304_s28 }
  0x44   : > { %s302_s27 = scalar_lea.hbm %s819_s1, %s393_s24  ;;  %s292_s2 = scalar_lea.sflag [#allocation5], %s152_s19 }
  0x45   : > { %s306_s29 = sshll.u32 %s302_s27, 4  ;;  %s545_s9 = scalar_lea.hbm %s819_s1, 16  ;;  %s307_s29 = int_to_ptr.hbm [resolvable:$true] %s306_s29 }
  0x46   : > { %s539_s3 = sshra.s32 %s307_s29, 4  ;;  %s540_s3 = int_to_ptr.hbm [resolvable:$true] %s539_s3 }
  0x47   : > { %v205_v21 = vld [vmem:[#allocation2] sm:$0xff]  ;;  %s541_s4 = scalar_lea.hbm %s540_s3, 8  ;;  %p546_p7 = scmp.lt.s32.totalorder %s540_s3, %s819_s1 }
  0x48   : > { %v211_v22 = vperm.slane %v205_v21, 0  ;;  %v212_v23 = vperm.slane %v205_v21, 1  ;;  %v213_v24 = vperm.slane %v205_v21, 2  ;;  %v214_v25 = vperm.slane %v205_v21, 3  ;;  %v206_v36 = vld [vmem:[#allocation2 + $0x8] sm:$0xff]  ;;  %p542_p2 = scmp.ne.s32.totalorder %s540_s3, %s541_s4  ;;  %p547_p4 = scmp.lt.s32.totalorder %s545_s9, %s541_s4 }
  0x49   : > { %v215_v26 = vperm.slane %v205_v21, 4  ;;  %v216_v31 = vperm.slane %v205_v21, 5  ;;  %v217_v34 = vperm.slane %v205_v21, 6  ;;  %v218_v38 = vperm.slane %v205_v21, 7  ;;  %v494_v1 = vld [vmem:[#allocation2 + $0x10] ss:$0 sm:$0xff] }
  0x4a   : > { %v246_v27 = vsel %vm245_vm1, %v211_v22, 0.0  ;;  %v247_v28 = vsel %vm245_vm1, %v212_v23, 0.0  ;;  %v249_v29 = vsel %vm245_vm1, %v213_v24, 0.0  ;;  %v251_v32 = vsel %vm245_vm1, %v214_v25, 0.0  ;;  %p543_p3 = pnand %p542_p2, %p706_p12  ;;  %p548_p8 = por %p547_p4, %p546_p7 }
  0x4b   : > { %v248_v30 = vadd.f32 %v247_v28, %v246_v27  ;;  %v253_v35 = vsel %vm245_vm1, %v215_v26, 0.0  ;;  %v255_v39 = vsel %vm245_vm1, %v216_v31, 0.0  ;;  %v219_v41 = vperm.slane %v206_v36, 0 }
  0x4c   : > { %v257_v42 = vsel %vm245_vm1, %v217_v34, 0.0  ;;  %v220_v44 = vperm.slane %v206_v36, 1  ;;  %v259_v45 = vsel %vm245_vm1, %v218_v38, 0.0  ;;  %v221_v47 = vperm.slane %v206_v36, 2  ;;  %p544_p5 = pneg %p543_p3 }
  0x4d   : > { %v250_v33 = vadd.f32 %v249_v29, %v248_v30  ;;  %v261_v48 = vsel %vm245_vm1, %v219_v41, 0.0  ;;  %v222_v50 = vperm.slane %v206_v36, 3  ;;  %v223_v53 = vperm.slane %v206_v36, 4 }
  0x4e   : > { %v263_v51 = vsel %vm245_vm1, %v220_v44, 0.0  ;;  %v265_v54 = vsel %vm245_vm1, %v221_v47, 0.0  ;;  %v224_v56 = vperm.slane %v206_v36, 5  ;;  %v225_v59 = vperm.slane %v206_v36, 6  ;;  %p549_p9 = pnand %p548_p8, %p544_p5 }
  0x4f   : > { %v252_v37 = vadd.f32 %v251_v32, %v250_v33  ;;  %v267_v57 = vsel %vm245_vm1, %v222_v50, 0.0  ;;  %v269_v60 = vsel %vm245_vm1, %v223_v53, 0.0  ;;  %v226_v62 = vperm.slane %v206_v36, 7 }
  0x50   : > { %v271_v63 = vsel %vm245_vm1, %v224_v56, 0.0  ;;  %v273_v2 = vsel %vm245_vm1, %v225_v59, 0.0  ;;  %v278_v6 = vsel %vm277_vm2, %v494_v1, 0.0 }
  0x51   : > { %v254_v40 = vadd.f32 %v253_v35, %v252_v37  ;;  %v275_v4 = vsel %vm245_vm1, %v226_v62, 0.0 }
  0x53   : > { %v256_v43 = vadd.f32 %v255_v39, %v254_v40 }
  0x55   : > { %v258_v46 = vadd.f32 %v257_v42, %v256_v43 }
  0x57   : > { %v260_v49 = vadd.f32 %v259_v45, %v258_v46 }
  0x59   : > { %v262_v52 = vadd.f32 %v261_v48, %v260_v49 }
  0x5b   : > { %v264_v55 = vadd.f32 %v263_v51, %v262_v52 }
  0x5d   : > { %v266_v58 = vadd.f32 %v265_v54, %v264_v55 }
  0x5f   : > { %v268_v61 = vadd.f32 %v267_v57, %v266_v58 }
  0x61   : > { %v270_v0 = vadd.f32 %v269_v60, %v268_v61 }
  0x63   : > { %v272_v3 = vadd.f32 %v271_v63, %v270_v0 }
  0x65   : > { %v274_v5 = vadd.f32 %v273_v2, %v272_v3 }
  0x67   : > { %v276_v7 = vadd.f32 %v275_v4, %v274_v5 }
  0x69   : > { %v279_v8 = vadd.f32 %v278_v6, %v276_v7 }
  0x6b   : > { %280 = vadd.xlane.f32.xlu0 %v279_v8 }
  0xde   : > { %v281_v9 = vpop.xlane.xlu0 %280 }
  0xdf   : > { %v282_v10 = vrot.slane %v281_v9, 4 }
  0xe1   : > { %v283_v11 = vadd.f32 %v282_v10, %v281_v9 }
  0xe3   : > { %v284_v12 = vrot.slane %v283_v11, 2 }
  0xe5   : > { %v285_v13 = vadd.f32 %v284_v12, %v283_v11 }
  0xe7   : > { %v286_v14 = vrot.slane %v285_v13, 1 }
  0xe9   : > { %v287_v15 = vadd.f32 %v286_v14, %v285_v13 }
  0xeb   : > { %399 = vpush %v287_v15 }
 0x11c   : > { %s400_s30 = spop %399 }
 0x11d   : > { %v289_v16 = vstv %s400_s30 }
 0x11e   : > { %290 = vst [vmem:[%s154_s18] sm:$0xff] %v289_v16 }
 0x11f   : > { %552 = shalt.err (!%p549_p9)
}
 0x120   : > { %403 = dma.vmem_to_hbm [thread:$0]  (%p706_p12), %s305_s28, 128, %s307_s29, %s292_s2  }
 0x121 PF: > { %s318_s17 = sand.u32 1, %s600_s6   ;;  %p410_p10 = pnand %p388_p13, %p711_p0 }
 0x122   : > { %s319_s19 = scalar_lea.sflag [#allocation5], %s318_s17 }
 0x123   : > { %p411_p11 = pneg %p410_p10 }
 0x125   : > { %594 = dma.done.wait (%p411_p11), %s319_s19, 128  }
 0x126   : > { %596 = vsyncadd (%p411_p11), %s319_s19, 4294967168  ;;  %s17_s13 = sadd.s32 1, %s628_s13   ;;  %s827_s6 = smov %s604_s7 }
 0x127   : > { %p14_p1 = scmp.ge.s32.totalorder %s17_s13, 4   ;;  %s828_s7 = smov %s608_s8 }
 0x128   : > { %s829_s8 = smov %s700_s21  ;;  %s830_s9 = smov %s616_s10 }
 0x129   : > { %s808_s10 = smov 0   ;;  %s831_s11 = smov %s624_s12 }
 0x12a   : > { %s832_s12 = smov %s834_s16  ;;  %16 = sbr.rel (!%p14_p1) target bundleno = 7 (0x7), region = 81 }
 0x12f   :  { %325 = vsyncpa [#allocation4], 1 }
 0x130   :  { %327 = vsyncpa [#allocation4 + $0x1], 1 }
 0x131   :  { %328 = vsyncpa [#allocation5], 1 }
 0x132   :  { %330 = vsyncpa [#allocation5 + $0x1], 1 }

</bundles_post_ra>
